<compile_context>
chip_gen: v7x
topology: tpu7x:2x2x1
jax: 0.10.0
libtpu: 0.0.40
codegen_flags: <defaults>
</compile_context>

<pallas_src>
import functools

import jax
import jax.numpy as jnp
from jax.experimental import pallas as pl
from jax.experimental.pallas import tpu as pltpu

_LANES = 128
_SUBLANES = 8


def _round_up(x, m):
    return ((x + m - 1) // m) * m


def _rpn_regr_loss_kernel(x_ref, sum_ref, cnt_ref, *, sigma):
    # x_ref  : (5, TM, 128) input dtype; channels = [cls, dy_t, dh_t, dy_p, dh_p]
    # sum_ref: (1, 8, 128) f32 per-split partial loss-sum (output-resident acc)
    # cnt_ref: (1, 8, 128) f32 per-split partial keep-count (output-resident acc)
    b = pl.program_id(1)

    @pl.when(b == 0)
    def _():
        sum_ref[...] = jnp.zeros_like(sum_ref)
        cnt_ref[...] = jnp.zeros_like(cnt_ref)

    cls = x_ref[0].astype(jnp.float32)          # (TM, 128)
    keep = cls == 1.0                           # exact compare, as torch

    inv_sigma = 1.0 / sigma
    d0 = jnp.abs(x_ref[1].astype(jnp.float32) - x_ref[3].astype(jnp.float32))
    d1 = jnp.abs(x_ref[2].astype(jnp.float32) - x_ref[4].astype(jnp.float32))
    l0 = jnp.where(d0 < inv_sigma, (0.5 * sigma) * d0 * d0, d0 - 0.5 * inv_sigma)
    l1 = jnp.where(d1 < inv_sigma, (0.5 * sigma) * d1 * d1, d1 - 0.5 * inv_sigma)

    # Masked contributions with a single select each (no mask*... multiply).
    contrib = jnp.where(keep, l0 + l1, 0.0)     # (TM, 128) f32
    ones = jnp.where(keep, 1.0, 0.0)            # (TM, 128) f32

    tm = contrib.shape[0]
    # VPU-only tree-add (TM,128)->(8,128): sum over the leading (non-tiled)
    # axis is plain vreg adds, so the per-step accumulator RMW touches only one
    # (8,128) tile instead of the whole (TM,128) block.
    contrib8 = jnp.sum(contrib.reshape(tm // _SUBLANES, _SUBLANES, _LANES), axis=0)
    ones8 = jnp.sum(ones.reshape(tm // _SUBLANES, _SUBLANES, _LANES), axis=0)

    sum_ref[0] += contrib8
    cnt_ref[0] += ones8


def rpn_regr_loss(y_pred, y_true, sigma=9.0, *, block_rows=2048, num_splits=1):
    """y_pred: (1, N, 2), y_true: (1, N, 3) (f32 or bf16) -> scalar f32 loss.

    num_splits: keep 1 on single-TensorCore parts (v5e, v6e); use 2 on v7x so
    the leading "parallel" grid axis can shard across both TensorCores.
    block_rows: anchor-rows (of 128 anchors) per grid step; 2048 keeps the
    double-buffered block well under the scoped-VMEM default on all parts
    (and is the recommended cap for v7x's 64 MiB VMEM).
    """
    n = y_pred.shape[1]

    rows = -(-n // _LANES)                                    # anchor rows of 128
    # Multiple of 16 so bf16 sublane packing is legal too.
    tm = _round_up(min(block_rows, max(-(-rows // num_splits), _SUBLANES)), 16)
    bps = -(-rows // (num_splits * tm))                       # blocks per split
    rows_padded = num_splits * bps * tm
    pad = rows_padded * _LANES - n

    # Single fused relayout: concat targets+preds once, go channel-planar and
    # lane-dense, pad tail anchors with zeros (cls == 0 -> they contribute to
    # neither sum nor count).  Input dtype is preserved (bf16 stays bf16); the
    # upcast to f32 happens inside the kernel.
    x = jnp.concatenate([y_true[0], y_pred[0]], axis=-1)      # (N, 5)
    x = jnp.transpose(x, (1, 0))                              # (5, N)
    x = jnp.pad(x, ((0, 0), (0, pad))).reshape(5, rows_padded, _LANES)

    kernel = functools.partial(_rpn_regr_loss_kernel, sigma=float(sigma))

    sums, cnts = pl.pallas_call(
        kernel,
        out_shape=(
            jax.ShapeDtypeStruct((num_splits, _SUBLANES, _LANES), jnp.float32),
            jax.ShapeDtypeStruct((num_splits, _SUBLANES, _LANES), jnp.float32),
        ),
        grid_spec=pltpu.PrefetchScalarGridSpec(
            num_scalar_prefetch=0,
            grid=(num_splits, bps),
            in_specs=[
                # One merged 5-channel block -> one contiguous DMA per step.
                pl.BlockSpec((5, tm, _LANES), lambda s, b: (0, s * bps + b, 0)),
            ],
            out_specs=[
                # Lane-dense (8,128) partials; block index constant across the
                # "arbitrary" axis so it stays resident as an accumulator.
                pl.BlockSpec((1, _SUBLANES, _LANES), lambda s, b: (s, 0, 0)),
                pl.BlockSpec((1, _SUBLANES, _LANES), lambda s, b: (s, 0, 0)),
            ],
        ),
        compiler_params=pltpu.CompilerParams(
            # On v7x, verify in xprof the "parallel" axis shards across both
            # TensorCores (otherwise switch it to pltpu.CORE_PARALLEL).
            dimension_semantics=("parallel", "arbitrary"),
            allow_input_fusion=[True],
        ),
    )(x)

    total = jnp.sum(sums)
    count = jnp.sum(cnts)
    # torch.mean over kept anchors; 0.0 if none kept (numel() == 0 path).
    return jnp.where(count > 0.0, total / jnp.maximum(count, 1.0), 0.0)


def _reference(y_pred, y_true, sigma):
    """Pure-JAX reference with the same masked-mean semantics as the torch code."""
    yp = y_pred[0].astype(jnp.float32)
    yt = y_true[0].astype(jnp.float32)
    diff = jnp.abs(yt[:, 1:3] - yp)
    less_one = (diff < 1.0 / sigma).astype(jnp.float32)
    l = less_one * 0.5 * diff ** 2 * sigma + (1.0 - less_one) * (diff - 0.5 / sigma)
    per_anchor = jnp.sum(l, axis=1)
    m = (yt[:, 0] == 1.0).astype(jnp.float32)
    cnt = jnp.sum(m)
    return jnp.where(cnt > 0, jnp.sum(per_anchor * m) / jnp.maximum(cnt, 1.0), 0.0)


if __name__ == "__main__":
    key = jax.random.PRNGKey(0)
    k_pred, k_regr, k_cls = jax.random.split(key, 3)

    N = 300  # deliberately not a multiple of 128 (exercises tail padding)
    sigma = 9.0

    # y_pred: (1, N, 2) regression predictions
    y_pred = jax.random.normal(k_pred, (1, N, 2), dtype=jnp.float32)
    # y_true: (1, N, 3) -> [:, :, 0] = cls in {0, 1}, [:, :, 1:3] = regr targets
    cls = (jax.random.uniform(k_cls, (1, N, 1)) > 0.5).astype(jnp.float32)
    regr = jax.random.normal(k_regr, (1, N, 2), dtype=jnp.float32)
    y_true = jnp.concatenate([cls, regr], axis=-1)

    ref = _reference(y_pred, y_true, sigma)

    # Default single-split path (v5e / v6e).
    loss = jax.block_until_ready(rpn_regr_loss(y_pred, y_true, sigma=sigma))
    assert jnp.allclose(loss, ref, atol=1e-5, rtol=1e-5), (loss, ref)

    # Two-way split path (v7x megacore sharding) must agree.
    loss2 = jax.block_until_ready(
        rpn_regr_loss(y_pred, y_true, sigma=sigma, num_splits=2))
    assert jnp.allclose(loss2, ref, atol=1e-5, rtol=1e-5), (loss2, ref)

    # bf16 inputs: half the HBM bytes, upcast to f32 inside the kernel.
    loss_bf16 = jax.block_until_ready(
        rpn_regr_loss(y_pred.astype(jnp.bfloat16), y_true.astype(jnp.bfloat16),
                      sigma=sigma))
    assert jnp.allclose(loss_bf16, ref, rtol=5e-2, atol=5e-2), (loss_bf16, ref)

    # Empty-positive case must return exactly 0.0 (torch fallback path).
    y_true_empty = y_true.at[:, :, 0].set(0.0)
    loss0 = jax.block_until_ready(rpn_regr_loss(y_pred, y_true_empty, sigma=sigma))
    assert jnp.allclose(loss0, 0.0), loss0

    print("KERNEL_OK")
</pallas_src>

<mosaic_0001>
module attributes {stable_mosaic.version = 11 : i64} {
  func.func @_rpn_regr_loss_kernel(%arg0: i32, %arg1: i32, %arg2: memref<5x16x128xf32, #tpu.memory_space<vmem>>, %arg3: memref<1x8x128xf32, #tpu.memory_space<vmem>>, %arg4: memref<1x8x128xf32, #tpu.memory_space<vmem>>) attributes {dimension_semantics = [#tpu.dimension_semantics<parallel>, #tpu.dimension_semantics<arbitrary>], iteration_bounds = array<i64: 1, 1>, scalar_prefetch = 0 : i64, scratch_operands = 0 : i64, tpu.core_type = #tpu.core_type<tc>, window_params = [{transform_indices = @transform_0, window_bounds = array<i64: 5, 16, 128>}, {transform_indices = @transform_1, window_bounds = array<i64: 1, 8, 128>}, {transform_indices = @transform_2, window_bounds = array<i64: 1, 8, 128>}]} {
    %c0_i32 = arith.constant 0 : i32
    %0 = arith.cmpi eq, %arg1, %c0_i32 : i32
    %1 = arith.extui %0 : i1 to i32
    %c0_i32_0 = arith.constant 0 : i32
    %2 = arith.cmpi ne, %1, %c0_i32_0 : i32
    scf.if %2 {
      %cst_34 = arith.constant 0.000000e+00 : f32
      %57 = vector.broadcast %cst_34 : f32 to vector<1x8x128xf32>
      %c0_35 = arith.constant 0 : index
      %c0_36 = arith.constant 0 : index
      %c0_37 = arith.constant 0 : index
      %58 = vector.load %arg3[%c0_35, %c0_36, %c0_37] : memref<1x8x128xf32, #tpu.memory_space<vmem>>, vector<1x8x128xf32>
      tpu.vector_store %arg3[%c0_35, %c0_36, %c0_37], %57 {strides = array<i32>} : memref<1x8x128xf32, #tpu.memory_space<vmem>>, vector<1x8x128xf32>,
      %cst_38 = arith.constant 0.000000e+00 : f32
      %59 = vector.broadcast %cst_38 : f32 to vector<1x8x128xf32>
      %c0_39 = arith.constant 0 : index
      %c0_40 = arith.constant 0 : index
      %c0_41 = arith.constant 0 : index
      %60 = vector.load %arg4[%c0_39, %c0_40, %c0_41] : memref<1x8x128xf32, #tpu.memory_space<vmem>>, vector<1x8x128xf32>
      tpu.vector_store %arg4[%c0_39, %c0_40, %c0_41], %59 {strides = array<i32>} : memref<1x8x128xf32, #tpu.memory_space<vmem>>, vector<1x8x128xf32>,
    } else {
    }
    %c0 = arith.constant 0 : index
    %c0_1 = arith.constant 0 : index
    %c0_2 = arith.constant 0 : index
    %3 = vector.load %arg2[%c0, %c0_1, %c0_2] : memref<5x16x128xf32, #tpu.memory_space<vmem>>, vector<1x16x128xf32>
    %4 = vector.shape_cast %3 : vector<1x16x128xf32> to vector<16x128xf32>
    %cst = arith.constant 1.000000e+00 : f32
    %5 = vector.broadcast %cst : f32 to vector<16x128xf32>
    %6 = arith.cmpf oeq, %4, %5 : vector<16x128xf32>
    %c1 = arith.constant 1 : index
    %c0_3 = arith.constant 0 : index
    %c0_4 = arith.constant 0 : index
    %7 = vector.load %arg2[%c1, %c0_3, %c0_4] : memref<5x16x128xf32, #tpu.memory_space<vmem>>, vector<1x16x128xf32>
    %8 = vector.shape_cast %7 : vector<1x16x128xf32> to vector<16x128xf32>
    %c3 = arith.constant 3 : index
    %c0_5 = arith.constant 0 : index
    %c0_6 = arith.constant 0 : index
    %9 = vector.load %arg2[%c3, %c0_5, %c0_6] : memref<5x16x128xf32, #tpu.memory_space<vmem>>, vector<1x16x128xf32>
    %10 = vector.shape_cast %9 : vector<1x16x128xf32> to vector<16x128xf32>
    %11 = arith.subf %8, %10 : vector<16x128xf32>
    %12 = math.absf %11 : vector<16x128xf32>
    %c2 = arith.constant 2 : index
    %c0_7 = arith.constant 0 : index
    %c0_8 = arith.constant 0 : index
    %13 = vector.load %arg2[%c2, %c0_7, %c0_8] : memref<5x16x128xf32, #tpu.memory_space<vmem>>, vector<1x16x128xf32>
    %14 = vector.shape_cast %13 : vector<1x16x128xf32> to vector<16x128xf32>
    %c4 = arith.constant 4 : index
    %c0_9 = arith.constant 0 : index
    %c0_10 = arith.constant 0 : index
    %15 = vector.load %arg2[%c4, %c0_9, %c0_10] : memref<5x16x128xf32, #tpu.memory_space<vmem>>, vector<1x16x128xf32>
    %16 = vector.shape_cast %15 : vector<1x16x128xf32> to vector<16x128xf32>
    %17 = arith.subf %14, %16 : vector<16x128xf32>
    %18 = math.absf %17 : vector<16x128xf32>
    %cst_11 = arith.constant 0.111111112 : f32
    %19 = vector.broadcast %cst_11 : f32 to vector<16x128xf32>
    %20 = arith.cmpf olt, %12, %19 : vector<16x128xf32>
    %cst_12 = arith.constant 4.500000e+00 : f32
    %21 = vector.broadcast %cst_12 : f32 to vector<16x128xf32>
    %22 = arith.mulf %21, %12 : vector<16x128xf32>
    %23 = arith.mulf %22, %12 : vector<16x128xf32>
    %cst_13 = arith.constant 0.055555556 : f32
    %24 = vector.broadcast %cst_13 : f32 to vector<16x128xf32>
    %25 = arith.subf %12, %24 : vector<16x128xf32>
    %26 = arith.select %20, %23, %25 : vector<16x128xi1>, vector<16x128xf32>
    %cst_14 = arith.constant 0.111111112 : f32
    %27 = vector.broadcast %cst_14 : f32 to vector<16x128xf32>
    %28 = arith.cmpf olt, %18, %27 : vector<16x128xf32>
    %cst_15 = arith.constant 4.500000e+00 : f32
    %29 = vector.broadcast %cst_15 : f32 to vector<16x128xf32>
    %30 = arith.mulf %29, %18 : vector<16x128xf32>
    %31 = arith.mulf %30, %18 : vector<16x128xf32>
    %cst_16 = arith.constant 0.055555556 : f32
    %32 = vector.broadcast %cst_16 : f32 to vector<16x128xf32>
    %33 = arith.subf %18, %32 : vector<16x128xf32>
    %34 = arith.select %28, %31, %33 : vector<16x128xi1>, vector<16x128xf32>
    %35 = arith.addf %26, %34 : vector<16x128xf32>
    %cst_17 = arith.constant 0.000000e+00 : f32
    %36 = vector.broadcast %cst_17 : f32 to vector<16x128xf32>
    %37 = arith.select %6, %35, %36 : vector<16x128xi1>, vector<16x128xf32>
    %cst_18 = arith.constant 1.000000e+00 : f32
    %cst_19 = arith.constant 0.000000e+00 : f32
    %38 = vector.broadcast %cst_18 : f32 to vector<16x128xf32>
    %39 = vector.broadcast %cst_19 : f32 to vector<16x128xf32>
    %40 = arith.select %6, %38, %39 : vector<16x128xi1>, vector<16x128xf32>
    %41 = vector.shape_cast %37 : vector<16x128xf32> to vector<2x8x128xf32>
    %cst_20 = arith.constant dense<0.000000e+00> : vector<8x128xf32>
    %42 = vector.multi_reduction <add>, %41, %cst_20 [0] : vector<2x8x128xf32> to vector<8x128xf32>
    %43 = vector.shape_cast %40 : vector<16x128xf32> to vector<2x8x128xf32>
    %cst_21 = arith.constant dense<0.000000e+00> : vector<8x128xf32>
    %44 = vector.multi_reduction <add>, %43, %cst_21 [0] : vector<2x8x128xf32> to vector<8x128xf32>
    %c0_22 = arith.constant 0 : index
    %c0_23 = arith.constant 0 : index
    %c0_24 = arith.constant 0 : index
    %45 = vector.load %arg3[%c0_22, %c0_23, %c0_24] : memref<1x8x128xf32, #tpu.memory_space<vmem>>, vector<1x8x128xf32>
    %46 = vector.shape_cast %45 : vector<1x8x128xf32> to vector<8x128xf32>
    %47 = arith.addf %46, %42 : vector<8x128xf32>
    %c0_25 = arith.constant 0 : index
    %c0_26 = arith.constant 0 : index
    %c0_27 = arith.constant 0 : index
    %48 = vector.load %arg3[%c0_25, %c0_26, %c0_27] : memref<1x8x128xf32, #tpu.memory_space<vmem>>, vector<1x8x128xf32>
    %49 = vector.shape_cast %48 : vector<1x8x128xf32> to vector<8x128xf32>
    %50 = vector.shape_cast %47 : vector<8x128xf32> to vector<1x8x128xf32>
    tpu.vector_store %arg3[%c0_25, %c0_26, %c0_27], %50 {strides = array<i32>} : memref<1x8x128xf32, #tpu.memory_space<vmem>>, vector<1x8x128xf32>,
    %c0_28 = arith.constant 0 : index
    %c0_29 = arith.constant 0 : index
    %c0_30 = arith.constant 0 : index
    %51 = vector.load %arg4[%c0_28, %c0_29, %c0_30] : memref<1x8x128xf32, #tpu.memory_space<vmem>>, vector<1x8x128xf32>
    %52 = vector.shape_cast %51 : vector<1x8x128xf32> to vector<8x128xf32>
    %53 = arith.addf %52, %44 : vector<8x128xf32>
    %c0_31 = arith.constant 0 : index
    %c0_32 = arith.constant 0 : index
    %c0_33 = arith.constant 0 : index
    %54 = vector.load %arg4[%c0_31, %c0_32, %c0_33] : memref<1x8x128xf32, #tpu.memory_space<vmem>>, vector<1x8x128xf32>
    %55 = vector.shape_cast %54 : vector<1x8x128xf32> to vector<8x128xf32>
    %56 = vector.shape_cast %53 : vector<8x128xf32> to vector<1x8x128xf32>
    tpu.vector_store %arg4[%c0_31, %c0_32, %c0_33], %56 {strides = array<i32>} : memref<1x8x128xf32, #tpu.memory_space<vmem>>, vector<1x8x128xf32>,
    return
  }
  func.func @transform_0(%arg0: i32, %arg1: i32) -> (i32, i32, i32) {
    %c1_i32 = arith.constant 1 : i32
    %0 = arith.muli %arg0, %c1_i32 : i32
    %1 = arith.addi %0, %arg1 : i32
    %c0_i32 = arith.constant 0 : i32
    %c0_i32_0 = arith.constant 0 : i32
    %c0_i32_1 = arith.constant 0 : i32
    return %c0_i32, %1, %c0_i32_0 : i32, i32, i32
  }
  func.func @transform_1(%arg0: i32, %arg1: i32) -> (i32, i32, i32) {
    %c0_i32 = arith.constant 0 : i32
    %c0_i32_0 = arith.constant 0 : i32
    %c0_i32_1 = arith.constant 0 : i32
    return %arg0, %c0_i32, %c0_i32_0 : i32, i32, i32
  }
  func.func @transform_2(%arg0: i32, %arg1: i32) -> (i32, i32, i32) {
    %c0_i32 = arith.constant 0 : i32
    %c0_i32_0 = arith.constant 0 : i32
    %c0_i32_1 = arith.constant 0 : i32
    return %arg0, %c0_i32, %c0_i32_0 : i32, i32, i32
  }
}

</mosaic_0001>

<bundles_post_ra>
// kernel: tpu_custom_call.1
= control target key start
LH: loop header
LB: loop body
LE: loop exit
PB: predicated region body
PF: predicated region fallthrough
CT: control target
= control target key end

     0   :  { %8 = vsyncpa [#allocation3], 0  ;;  %s282_s0 = inlined_call_operand.hbm [shape: f32[5,16,128], index: 0, kind: input, shape index: {}]   ;;  %s283_s1 = inlined_call_operand.hbm [shape: f32[1,8,128], index: 1, kind: output, shape index: {0}]   ;;  %s284_s2 = inlined_call_operand.hbm [shape: f32[1,8,128], index: 2, kind: output, shape index: {1}]  }
   0x1   :  { %9 = vsyncpa [#allocation4], 0 }
   0x2   :  { %10 = vsyncpa [#allocation7], 0  ;;  %s207_s9 = smov [#allocation2]   ;;  %s135_s13 = scalar_lea.hbm %s282_s0, 1280 }
   0x3   :  { %s20_s10 = sshll.u32 %s207_s9, 4  ;;  %p136_p0 = scmp.ne.s32.totalorder %s282_s0, %s135_s13  ;;  %s21_s10 = int_to_ptr.vmem [resolvable:$true] %s20_s10 }
   0x4   :  { %p139_p1 = scmp.lt.u32.totalorder %s135_s13, %s282_s0 }
   0x6   :  { %p141_p2 = pnand %p139_p1, %p136_p0 }
   0x8   :  { %144 = shalt.err (!%p141_p2)
}
   0x9   :  { %s145_s18 = scalar_lea.vmem %s21_s10, 1280  ;;  %p150_p4 = scmp.lt.s32.totalorder %s21_s10, %s21_s10 }
   0xa   :  { %p146_p3 = scmp.ne.s32.totalorder %s21_s10, %s145_s18  ;;  %p151_p5 = scmp.lt.s32.totalorder %s145_s18, %s145_s18 }
   0xc   :  { %p152_p6 = por %p151_p5, %p150_p4 }
   0xe   :  { %p153_p7 = pnand %p152_p6, %p146_p3 }
  0x10   :  { %156 = shalt.err (!%p153_p7)
}
  0x11   :  { %s208_s19 = smov 128   ;;  %s209_s20 = smov 8  }
  0x12   :  { %26 = dma.hbm_to_vmem [thread:$0]  %s282_s0, 1280, %s21_s10, [#allocation3], %s208_s19, %s208_s19, %s209_s20  }
  0x13   :  { %201 = dma.done.wait [#allocation3], 1280  }
  0x14   :  { %202 = vsyncadd [#allocation3], 4294966016  ;;  %v240_v0 = vld [vmem:[#allocation2] sm:$0xff]  ;;  %v242_v1 = vld [vmem:[#allocation2 + $0x8] sm:$0xff]  ;;  %v210_v11 = vmov 0.0   ;;  %s211_s0 = smov [#allocation6]  }
  0x15   :  { %v43_v2 = vld [vmem:[#allocation2 + $0x10] sm:$0xff]  ;;  %vm40_vm0 = vcmp.eq.f32.partialorder %v240_v0, 1.0  ;;  %vm41_vm1 = vcmp.eq.f32.partialorder %v242_v1, 1.0  ;;  %v44_v3 = vld [vmem:[#allocation2 + $0x18] sm:$0xff]  ;;  %v53_v8 = vld [vmem:[#allocation2 + $0x20] sm:$0xff]  ;;  %s112_s23 = sshll.u32 %s211_s0, 4  ;;  %s113_s23 = int_to_ptr.vmem [resolvable:$true] %s112_s23 }
  0x16   :  { %v46_v4 = vld [vmem:[#allocation2 + $0x30] sm:$0xff]  ;;  %v47_v5 = vld [vmem:[#allocation2 + $0x38] sm:$0xff]  ;;  %v54_v9 = vld [vmem:[#allocation2 + $0x28] sm:$0xff]  ;;  %v86_v12 = vsel %vm40_vm0, 1.0, %v210_v11  ;;  %v87_v13 = vsel %vm41_vm1, 1.0, %v210_v11  ;;  %s157_s24 = scalar_lea.vmem %s113_s23, 128  ;;  %p162_p9 = scmp.lt.s32.totalorder %s113_s23, %s113_s23 }
  0x17   :  { %v48_v6 = vsub.f32 %v43_v2, %v46_v4  ;;  %v49_v7 = vsub.f32 %v44_v3, %v47_v5  ;;  %v56_v10 = vld [vmem:[#allocation2 + $0x40] sm:$0xff]  ;;  %v57_v14 = vld [vmem:[#allocation2 + $0x48] sm:$0xff]  ;;  %v89_v16 = vadd.f32 %v87_v13, %v86_v12  ;;  %p158_p8 = scmp.ne.s32.totalorder %s113_s23, %s157_s24  ;;  %p163_p10 = scmp.lt.s32.totalorder %s157_s24, %s157_s24 }
  0x18   :  { %v58_v15 = vsub.f32 %v53_v8, %v56_v10  ;;  %v59_v19 = vsub.f32 %v54_v9, %v57_v14 }
  0x19   :  { %v50_v17 = vand.u32 2147483647, %v48_v6  ;;  %v51_v18 = vand.u32 2147483647, %v49_v7  ;;  %95 = vst [vmem:[#allocation6] sm:$0xff] %v89_v16  ;;  %p164_p11 = por %p163_p10, %p162_p9 }
  0x1a   :  { %v60_v20 = vand.u32 2147483647, %v58_v15  ;;  %v61_v21 = vand.u32 2147483647, %v59_v19 }
  0x1b   :  { %vm62_vm2 = vcmp.lt.f32.partialorder %v50_v17, 0.11111111  ;;  %vm63_vm3 = vcmp.lt.f32.partialorder %v51_v18, 0.11111111  ;;  %v64_v22 = vmul.f32 4.5, %v50_v17  ;;  %v65_v23 = vmul.f32 4.5, %v51_v18  ;;  %p165_p12 = pnand %p164_p11, %p158_p8 }
  0x1c   :  { %v125_v24 = vadd.f32 -0.055555556, %v50_v17  ;;  %v126_v25 = vadd.f32 -0.055555556, %v51_v18  ;;  %vm72_vm4 = vcmp.lt.f32.partialorder %v60_v20, 0.11111111 }
  0x1d   :  { %vm73_vm5 = vcmp.lt.f32.partialorder %v61_v21, 0.11111111  ;;  %v74_v26 = vmul.f32 4.5, %v60_v20  ;;  %v75_v27 = vmul.f32 4.5, %v61_v21  ;;  %v66_v28 = vmul.f32 %v64_v22, %v50_v17 }
  0x1e   :  { %v67_v29 = vmul.f32 %v65_v23, %v51_v18  ;;  %v127_v30 = vadd.f32 -0.055555556, %v60_v20  ;;  %v128_v31 = vadd.f32 -0.055555556, %v61_v21 }
  0x1f   :  { %168 = shalt.err (!%p165_p12)
}
  0x20   :  { %s169_s27 = scalar_lea.hbm %s284_s2, 128 }
  0x21   :  { %p170_p13 = scmp.ne.s32.totalorder %s284_s2, %s169_s27  ;;  %p173_p0 = scmp.lt.u32.totalorder %s169_s27, %s284_s2 }
  0x23   :  { %p175_p1 = pnand %p173_p0, %p170_p13 }
  0x25   :  { %178 = shalt.err (!%p175_p1)
}
  0x26   :  { %115 = dma.vmem_to_hbm [thread:$0]  %s113_s23, 128, %s284_s2, [#allocation7]   ;;  %v76_v32 = vmul.f32 %v74_v26, %v60_v20  ;;  %v77_v33 = vmul.f32 %v75_v27, %v61_v21  ;;  %v70_v34 = vsel %vm62_vm2, %v66_v28, %v125_v24  ;;  %v71_v35 = vsel %vm63_vm3, %v67_v29, %v126_v25 }
  0x27   :  { %s212_s6 = smov [#allocation5]  }
  0x28   :  { %v80_v36 = vsel %vm72_vm4, %v76_v32, %v127_v30  ;;  %v81_v37 = vsel %vm73_vm5, %v77_v33, %v128_v31  ;;  %s102_s2 = sshll.u32 %s212_s6, 4  ;;  %s103_s2 = int_to_ptr.vmem [resolvable:$true] %s102_s2 }
  0x29   :  { %v82_v38 = vadd.f32 %v80_v36, %v70_v34  ;;  %v83_v39 = vadd.f32 %v81_v37, %v71_v35  ;;  %s179_s7 = scalar_lea.vmem %s103_s2, 128  ;;  %p184_p3 = scmp.lt.s32.totalorder %s103_s2, %s103_s2 }
  0x2a   :  { %p180_p2 = scmp.ne.s32.totalorder %s103_s2, %s179_s7  ;;  %p185_p4 = scmp.lt.s32.totalorder %s179_s7, %s179_s7 }
  0x2b   :  { %v84_v40 = vsel %vm40_vm0, %v82_v38, 0.0  ;;  %v85_v41 = vsel %vm41_vm1, %v83_v39, 0.0 }
  0x2c   :  { %v88_v42 = vadd.f32 %v85_v41, %v84_v40  ;;  %p186_p5 = por %p185_p4, %p184_p3 }
  0x2e   :  { %92 = vst [vmem:[#allocation5] sm:$0xff] %v88_v42  ;;  %p187_p6 = pnand %p186_p5, %p180_p2 }
  0x30   :  { %190 = shalt.err (!%p187_p6)
}
  0x31   :  { %s191_s10 = scalar_lea.hbm %s283_s1, 128 }
  0x32   :  { %p192_p7 = scmp.ne.s32.totalorder %s283_s1, %s191_s10  ;;  %p195_p8 = scmp.lt.u32.totalorder %s191_s10, %s283_s1 }
  0x34   :  { %p197_p9 = pnand %p195_p8, %p192_p7 }
  0x36   :  { %200 = shalt.err (!%p197_p9)
}
  0x37   :  { %105 = dma.vmem_to_hbm [thread:$0]  %s103_s2, 128, %s283_s1, [#allocation4]  }
  0x38   :  { %203 = dma.done.wait [#allocation4], 128  }
  0x39   :  { %204 = vsyncadd [#allocation4], 4294967168 }
  0x3a   :  { %205 = dma.done.wait [#allocation7], 128  }
  0x3b   :  { %206 = vsyncadd [#allocation7], 4294967168 }
  0x3c   :  { %122 = vsyncpa [#allocation3], 1 }
  0x3d   :  { %123 = vsyncpa [#allocation4], 1 }
  0x3e   :  { %124 = vsyncpa [#allocation7], 1 }

</bundles_post_ra>
